<compile_context>
chip_gen: v7x
topology: tpu7x:2x2x1
jax: 0.10.0
libtpu: 0.0.40
codegen_flags: <defaults>
</compile_context>

<pallas_src>
import jax
import jax.numpy as jnp
from jax import lax
from jax.experimental import pallas as pl
from jax.experimental.pallas import tpu as pltpu

B = 2        # batch size
N_NEG = 8    # negative hypernyms per query
K = 24       # number of projection matrices (module constant k)
D = 128      # embedding dim (module uses dim=300; 128 picked for lane alignment)
VOCAB = 64   # synthetic vocab size


def hhd_kernel(q_ref, cn_ref, projT_ref, w_ref, b_ref, out_ref, acc_ref):
    """K-blocked grid: fold one proj slice per step, finalize at k == K-1.

    q_ref:     (B, D)            query embeddings (resident across the grid)
    cn_ref:    (B, 1+N_NEG, D)   [cand ; negs] embeddings (resident)
    projT_ref: (1, D, D)         proj_mats[k].T slice for this grid step
    w_ref:     (K,)   SMEM       Linear(k, 1) weight vector
    b_ref:     (1,)   SMEM       Linear bias
    out_ref:   (B, 1+N_NEG)      column 0 = simPos, columns 1.. = simNegs
    acc_ref:   (D, D)  VMEM      accumulator for wproj^T = sum_k w[k]*proj[k]^T
    """
    kk = pl.program_id(0)

    @pl.when(kk == 0)
    def _init():
        acc_ref[...] = jnp.zeros_like(acc_ref)

    # Fold this K-slice on the VPU (scalar * tile MAC); DMA of slice k+1 is
    # overlapped by the pipeline.
    acc_ref[...] += w_ref[kk] * projT_ref[0]

    @pl.when(kk == pl.num_programs(0) - 1)
    def _finalize():
        # wq[b, d] = sum_e q[b, e] * wprojT[e, d] — native (M,K)x(K,N) MXU shape,
        # no trans_b transpose.
        wq = lax.dot_general(q_ref[...], acc_ref[...],
                             dimension_numbers=(((1,), (0,)), ((), ())),
                             preferred_element_type=jnp.float32)        # (B, D)
        # Stacked [cand; negs] epilogue: sims[b, j] = sum_d cn[b, j, d]*wq[b, d].
        # TODO(synk): if B or N_NEG grow, reshape to (B*(1+N), D) and use a
        # dot_general / pad the output last dim to 128 for an unmasked store.
        sims = jnp.sum(cn_ref[...] * wq[:, None, :], axis=-1)           # (B, 1+N)
        out_ref[...] = sims + b_ref[0]


def hhd_forward(emb, proj_mats, out_w, out_b, query, cand, negs):
    # plain-JAX glue: embedding gather (index lookup) stays outside the kernel.
    # TODO(synk): a DMA-gather Pallas path for the embedding is overkill here.
    q_emb = emb[query]                                         # (B, D)
    cand_emb = emb[cand]                                       # (B, D)
    neg_emb = emb[negs]                                        # (B, N_NEG, D)
    # Stack cand with negs so the kernel emits ONE lane-dense (B, 1+N) output.
    cn = jnp.concatenate([cand_emb[:, None, :], neg_emb], axis=1)   # (B, 1+N, D)

    # Pre-transpose so the in-kernel fold directly builds wproj^T (E, D).
    projT = jnp.transpose(proj_mats, (0, 2, 1))                 # (K, E, D)

    w_vec = out_w.reshape(K).astype(jnp.float32)                # (K,) -> SMEM
    b_vec = out_b.reshape(1).astype(jnp.float32)                # (1,) -> SMEM

    out = pl.pallas_call(
        hhd_kernel,
        out_shape=jax.ShapeDtypeStruct((B, 1 + N_NEG), jnp.float32),
        grid=(K,),
        in_specs=[
            pl.BlockSpec((B, D), lambda kk: (0, 0)),                 # q_emb
            pl.BlockSpec((B, 1 + N_NEG, D), lambda kk: (0, 0, 0)),   # [cand; negs]
            pl.BlockSpec((1, D, D), lambda kk: (kk, 0, 0)),          # projT slice
            pl.BlockSpec(memory_space=pltpu.MemorySpace.SMEM),       # Linear weight
            pl.BlockSpec(memory_space=pltpu.MemorySpace.SMEM),       # Linear bias
        ],
        out_specs=pl.BlockSpec((B, 1 + N_NEG), lambda kk: (0, 0)),
        scratch_shapes=[pltpu.VMEM((D, D), jnp.float32)],
        compiler_params=pltpu.CompilerParams(
            dimension_semantics=("arbitrary",)),                     # K = reduction
    )(q_emb, cn, projT, w_vec, b_vec)

    pos = out[:, :1]           # (B, 1)   simPosOutput
    negout = out[:, 1:]        # (B, N)   simNegsOutput
    return pos, negout


if __name__ == "__main__":
    key = jax.random.PRNGKey(0)
    k1, k2, k3, k4, k5, k6, k7 = jax.random.split(key, 7)

    # deterministic parameter init (shapes from HHD.__init__)
    emb = jax.random.normal(k1, (VOCAB, D), dtype=jnp.float32)     # nn.Embedding ~ N(0,1)
    var = 2.0 / (D + D)                                            # used as std in .normal_
    proj_mats = (jax.random.normal(k2, (K, D, D), dtype=jnp.float32) * var
                 + jnp.eye(D, dtype=jnp.float32)[None, :, :])      # N(0,var) + I
    lim = 1.0 / jnp.sqrt(jnp.float32(K))
    out_w = jax.random.uniform(k3, (1, K), minval=-lim, maxval=lim, dtype=jnp.float32)
    out_b = jax.random.uniform(k4, (1,), minval=-lim, maxval=lim, dtype=jnp.float32)

    # deterministic example inputs (token indices)
    query = jax.random.randint(k5, (B,), 0, VOCAB)
    cand = jax.random.randint(k6, (B,), 0, VOCAB)
    negs = jax.random.randint(k7, (B, N_NEG), 0, VOCAB)

    pos, negout = jax.block_until_ready(
        hhd_forward(emb, proj_mats, out_w, out_b, query, cand, negs))

    # pure-JAX reference check (module-faithful: per-k sims, then Linear(k->1))
    q_e, c_e, n_e = emb[query], emb[cand], emb[negs]
    bp = jnp.einsum('kde,be->bkd', proj_mats, q_e)
    ref_pos = (jnp.einsum('bkd,bd->bk', bp, c_e) @ out_w[0] + out_b[0])[:, None]
    ref_neg = jnp.einsum('bnd,bkd->bnk', n_e, bp) @ out_w[0] + out_b[0]
    assert pos.shape == (B, 1) and negout.shape == (B, N_NEG)
    assert jnp.allclose(pos, ref_pos, atol=1e-3, rtol=1e-3)
    assert jnp.allclose(negout, ref_neg, atol=1e-3, rtol=1e-3)

    print("KERNEL_OK")
</pallas_src>

<mosaic_0001>
module attributes {stable_mosaic.version = 11 : i64} {
  func.func @hhd_kernel(%arg0: i32, %arg1: memref<2x128xf32, #tpu.memory_space<vmem>>, %arg2: memref<2x9x128xf32, #tpu.memory_space<vmem>>, %arg3: memref<1x128x128xf32, #tpu.memory_space<vmem>>, %arg4: memref<24xf32, #tpu.memory_space<smem>>, %arg5: memref<1xf32, #tpu.memory_space<smem>>, %arg6: memref<2x9xf32, #tpu.memory_space<vmem>>, %arg7: memref<128x128xf32, #tpu.memory_space<vmem>>) attributes {dimension_semantics = [#tpu.dimension_semantics<arbitrary>], iteration_bounds = array<i64: 24>, scalar_prefetch = 0 : i64, scratch_operands = 1 : i64, tpu.core_type = #tpu.core_type<tc>, window_params = [{pipeline_mode = #tpu.pipeline_mode<synchronous>, transform_indices = @transform_0, window_bounds = array<i64: 2, 128>}, {pipeline_mode = #tpu.pipeline_mode<synchronous>, transform_indices = @transform_1, window_bounds = array<i64: 2, 9, 128>}, {transform_indices = @transform_2, window_bounds = array<i64: 1, 128, 128>}, {transform_indices = @transform_3, window_bounds = array<i64: 24>}, {transform_indices = @transform_4, window_bounds = array<i64: 1>}, {pipeline_mode = #tpu.pipeline_mode<synchronous>, transform_indices = @transform_5, window_bounds = array<i64: 2, 9>}]} {
    %c0_i32 = arith.constant 0 : i32
    %0 = arith.cmpi eq, %arg0, %c0_i32 : i32
    %1 = arith.extui %0 : i1 to i32
    %c0_i32_0 = arith.constant 0 : i32
    %2 = arith.cmpi ne, %1, %c0_i32_0 : i32
    scf.if %2 {
      %cst = arith.constant 0.000000e+00 : f32
      %15 = vector.broadcast %cst : f32 to vector<128x128xf32>
      %c0_8 = arith.constant 0 : index
      %c0_9 = arith.constant 0 : index
      %16 = vector.load %arg7[%c0_8, %c0_9] : memref<128x128xf32, #tpu.memory_space<vmem>>, vector<128x128xf32>
      tpu.vector_store %arg7[%c0_8, %c0_9], %15 {strides = array<i32>} : memref<128x128xf32, #tpu.memory_space<vmem>>, vector<128x128xf32>,
    } else {
    }
    %c0 = arith.constant 0 : index
    %c0_1 = arith.constant 0 : index
    %3 = vector.load %arg7[%c0, %c0_1] : memref<128x128xf32, #tpu.memory_space<vmem>>, vector<128x128xf32>
    %4 = arith.index_cast %arg0 : i32 to index
    %5 = memref.load %arg4[%4] : memref<24xf32, #tpu.memory_space<smem>>
    %c0_2 = arith.constant 0 : index
    %c0_3 = arith.constant 0 : index
    %c0_4 = arith.constant 0 : index
    %6 = vector.load %arg3[%c0_2, %c0_3, %c0_4] : memref<1x128x128xf32, #tpu.memory_space<vmem>>, vector<1x128x128xf32>
    %7 = vector.shape_cast %6 : vector<1x128x128xf32> to vector<128x128xf32>
    %8 = vector.broadcast %5 : f32 to vector<128x128xf32>
    %9 = arith.mulf %8, %7 : vector<128x128xf32>
    %10 = arith.addf %3, %9 : vector<128x128xf32>
    %c0_5 = arith.constant 0 : index
    %c0_6 = arith.constant 0 : index
    %11 = vector.load %arg7[%c0_5, %c0_6] : memref<128x128xf32, #tpu.memory_space<vmem>>, vector<128x128xf32>
    tpu.vector_store %arg7[%c0_5, %c0_6], %10 {strides = array<i32>} : memref<128x128xf32, #tpu.memory_space<vmem>>, vector<128x128xf32>,
    %c23_i32 = arith.constant 23 : i32
    %12 = arith.cmpi eq, %arg0, %c23_i32 : i32
    %13 = arith.extui %12 : i1 to i32
    %c0_i32_7 = arith.constant 0 : i32
    %14 = arith.cmpi ne, %13, %c0_i32_7 : i32
    scf.if %14 {
      %c0_8 = arith.constant 0 : index
      %c0_9 = arith.constant 0 : index
      %15 = vector.load %arg1[%c0_8, %c0_9] : memref<2x128xf32, #tpu.memory_space<vmem>>, vector<2x128xf32>
      %c0_10 = arith.constant 0 : index
      %c0_11 = arith.constant 0 : index
      %16 = vector.load %arg7[%c0_10, %c0_11] : memref<128x128xf32, #tpu.memory_space<vmem>>, vector<128x128xf32>
      %cst = arith.constant dense<0.000000e+00> : vector<2x128xf32>
      %17 = tpu.matmul %15, %16, %cst {dimension_numbers = #tpu.dot_dimension_numbers<[1], [0], [0], [1], [0, 0, 1, 1], [], []>} : vector<2x128xf32>, vector<128x128xf32>, vector<2x128xf32> -> vector<2x128xf32>
      %c0_12 = arith.constant 0 : index
      %c0_13 = arith.constant 0 : index
      %c0_14 = arith.constant 0 : index
      %18 = vector.load %arg2[%c0_12, %c0_13, %c0_14] : memref<2x9x128xf32, #tpu.memory_space<vmem>>, vector<2x9x128xf32>
      %19 = vector.shape_cast %17 : vector<2x128xf32> to vector<2x1x128xf32>
      %20 = vector.broadcast %19 : vector<2x1x128xf32> to vector<2x9x128xf32>
      %21 = arith.mulf %18, %20 : vector<2x9x128xf32>
      %cst_15 = arith.constant dense<0.000000e+00> : vector<2x9xf32>
      %22 = vector.multi_reduction <add>, %21, %cst_15 [2] : vector<2x9x128xf32> to vector<2x9xf32>
      %c0_16 = arith.constant 0 : index
      %23 = memref.load %arg5[%c0_16] : memref<1xf32, #tpu.memory_space<smem>>
      %24 = vector.broadcast %23 : f32 to vector<2x9xf32>
      %25 = arith.addf %22, %24 : vector<2x9xf32>
      %c0_17 = arith.constant 0 : index
      %c0_18 = arith.constant 0 : index
      %26 = vector.load %arg6[%c0_17, %c0_18] : memref<2x9xf32, #tpu.memory_space<vmem>>, vector<2x9xf32>
      tpu.vector_store %arg6[%c0_17, %c0_18], %25 {strides = array<i32>} : memref<2x9xf32, #tpu.memory_space<vmem>>, vector<2x9xf32>,
    } else {
    }
    return
  }
  func.func @transform_0(%arg0: i32) -> (i32, i32) {
    %c0_i32 = arith.constant 0 : i32
    %c0_i32_0 = arith.constant 0 : i32
    %c0_i32_1 = arith.constant 0 : i32
    return %c0_i32, %c0_i32_0 : i32, i32
  }
  func.func @transform_1(%arg0: i32) -> (i32, i32, i32) {
    %c0_i32 = arith.constant 0 : i32
    %c0_i32_0 = arith.constant 0 : i32
    %c0_i32_1 = arith.constant 0 : i32
    %c0_i32_2 = arith.constant 0 : i32
    return %c0_i32, %c0_i32_0, %c0_i32_1 : i32, i32, i32
  }
  func.func @transform_2(%arg0: i32) -> (i32, i32, i32) {
    %c0_i32 = arith.constant 0 : i32
    %c0_i32_0 = arith.constant 0 : i32
    %c0_i32_1 = arith.constant 0 : i32
    return %arg0, %c0_i32, %c0_i32_0 : i32, i32, i32
  }
  func.func @transform_3(%arg0: i32) -> i32 {
    %c0_i32 = arith.constant 0 : i32
    %c0_i32_0 = arith.constant 0 : i32
    return %c0_i32 : i32
  }
  func.func @transform_4(%arg0: i32) -> i32 {
    %c0_i32 = arith.constant 0 : i32
    %c0_i32_0 = arith.constant 0 : i32
    return %c0_i32 : i32
  }
  func.func @transform_5(%arg0: i32) -> (i32, i32) {
    %c0_i32 = arith.constant 0 : i32
    %c0_i32_0 = arith.constant 0 : i32
    %c0_i32_1 = arith.constant 0 : i32
    return %c0_i32, %c0_i32_0 : i32, i32
  }
}

</mosaic_0001>

<bundles_post_ra>
// kernel: tpu_custom_call.1
= control target key start
LH: loop header
LB: loop body
LE: loop exit
PB: predicated region body
PF: predicated region fallthrough
CT: control target
= control target key end

     0   :  { %s1213_s0 = inlined_call_operand.hbm [shape: f32[2,128], index: 0, kind: input, shape index: {}]   ;;  %s1214_s1 = inlined_call_operand.vmem [shape: f32[2,9,128], index: 1, kind: input, shape index: {}]   ;;  %s1215_s2 = inlined_call_operand.hbm [shape: f32[24,128,128], index: 2, kind: input, shape index: {}]   ;;  %s1216_s3 = inlined_call_operand.hbm [shape: f32[24], index: 3, kind: input, shape index: {}]   ;;  %s1217_s4 = inlined_call_operand.<no memory space> [shape: f32[1], index: 4, kind: input, shape index: {}]   ;;  %s1218_s5 = inlined_call_operand.hbm [shape: f32[2,9], index: 5, kind: output, shape index: {}]  }
   0x1   :  { %10 = sst [smem:[#allocation3]] %s1217_s4 }
   0x2   :  { %11 = vsyncpa [#allocation5], 0 }
   0x3   :  { %12 = vsyncpa [#allocation9], 0 }
   0x4   :  { %14 = vsyncpa [#allocation9 + $0x1], 0 }
   0x5   :  { %15 = vsyncpa [#allocation7], 0 }
   0x6   :  { %16 = vsyncpa [#allocation6], 0  ;;  %s978_s20 = smov 0   ;;  %s980_s21 = smov 0  }
   0x7   :  { %s982_s22 = smov 0   ;;  %s984_s23 = smov 0  }
   0x8 LB: > { %s997_s4 = sadd.s32 4294967295, %s932_s23   ;;  %s1000_s24 = sadd.s32 1, %s932_s23   ;;  %s932_s23 = sphi %s984_s23, %s1239_s23   ;;  %s928_s22 = sphi %s982_s22, %s1238_s22   ;;  %s924_s21 = sphi %s980_s21, %s1237_s21   ;;  %s920_s20 = sphi %s978_s20, %s1236_s20  }
   0x9   : > { %s68_s25 = ssub.s32 %s932_s23, %s1000_s24  ;;  %s71_s26 = sadd.s32 1, %s928_s22 }
   0xa   : > { %p69_p0 = scmp.eq.s32.totalorder %s68_s25, 0  ;;  %p78_p1 = scmp.ne.s32.totalorder %s928_s22, %s924_s21 }
   0xb   : > { %p79_p2 = scmp.eq.s32.totalorder %s932_s23, 0  ;;  %p84_p3 = scmp.ne.s32.totalorder %s924_s21, %s920_s20 }
   0xc   : > { %s1010_s27 = scalar_select %p69_p0, %s928_s22, %s71_s26  }
   0xd   : > { %p1012_p4 = por %p79_p2, %p78_p1  ;;  %p1219_p5 = scmp.eq.s32.totalorder %s997_s4, 0 }
   0xe   : > { %p621_p6 = scmp.ge.s32.totalorder %s932_s23, 1  ;;  %p158_p7 = scmp.lt.s32.totalorder %s932_s23, 25 }
   0xf   : > { %p1021_p8 = por %p1219_p5, %p84_p3  ;;  %s934_s6 = smov [#allocation4]  }
  0x10   : > { %p1026_p10 = pnand %p621_p6, %p158_p7  ;;  %s171_s7 = sshll.u32 %s934_s6, 4  ;;  %s172_s7 = int_to_ptr.vmem [resolvable:$true] %s171_s7 }
  0x11   : > { %s1224_s29 = scalar_select %p1021_p8, 1, 0 }
  0x12   : > { %s1225_s30 = scalar_select %p1026_p10, 1, 0 }
  0x13   : > { %p729_p11 = pneg %p1026_p10  ;;  %p742_p12 = scmp.lt.s32.totalorder %s932_s23, 24 }
  0x14   : > { %s197_s9 = sand.u32 1, %s928_s22   ;;  %s789_s14 = scalar_lea.hbm %s1213_s0, 32 }
  0x15   : > { %p1035_p13 = pnand %p729_p11, %p1219_p5  ;;  %p1042_p0 = pnand %p742_p12, %p1012_p4 }
  0x16   : > { %s1048_s11 = sshll.u32 %s197_s9, 7  ;;  %p790_p1 = scmp.ne.s32.totalorder %s1213_s0, %s789_s14 }
  0x17   : > { %s1227_s10 = scalar_select %p1042_p0, 1, 0 }
  0x18   : > { %p791_p2 = pneg %p1035_p13  ;;  %p796_p6 = scmp.lt.u32.totalorder %s789_s14, %s1213_s0 }
  0x1a   : > { %p792_p3 = pnand %p791_p2, %p790_p1 }
  0x1c   : > { %p793_p4 = pneg %p792_p3 }
  0x1e   : > { %p798_p7 = pnand %p796_p6, %p793_p4 }
  0x20   : > { %801 = shalt.err (!%p798_p7)
}
  0x21   : > { %s802_s19 = scalar_lea.vmem %s172_s7, 32  ;;  %p810_p5 = scmp.lt.s32.totalorder %s172_s7, %s172_s7 }
  0x22   : > { %p803_p11 = scmp.ne.s32.totalorder %s172_s7, %s802_s19  ;;  %p811_p8 = scmp.lt.s32.totalorder %s802_s19, %s802_s19 }
  0x24   : > { %p805_p12 = pnand %p803_p11, %p791_p2  ;;  %p812_p10 = por %p811_p8, %p810_p5 }
  0x26   : > { %p806_p9 = pneg %p805_p12 }
  0x28   : > { %p813_p0 = pnand %p812_p10, %p806_p9 }
  0x2a   : > { %816 = shalt.err (!%p813_p0)
}
  0x2b   : > { %732 = dma.hbm_to_vmem [thread:$0]  (!%p1035_p13), %s1213_s0, 32, %s172_s7, [#allocation5]  }
  0x2c   : > { %s817_s6 = scalar_lea.hbm %s1216_s3, 16 }
  0x2d   : > { %p818_p1 = scmp.ne.s32.totalorder %s1216_s3, %s817_s6  ;;  %p824_p9 = scmp.lt.u32.totalorder %s817_s6, %s1216_s3 }
  0x2f   : > { %p820_p5 = pnand %p818_p1, %p791_p2 }
  0x31   : > { %p821_p8 = pneg %p820_p5 }
  0x33   : > { %p826_p10 = pnand %p824_p9, %p821_p8 }
  0x35   : > { %829 = shalt.err (!%p826_p10)
}
  0x36   : > { %s935_s16 = smov [#allocation10]   ;;  %s638_s18 = sshll.u32 %s932_s23, 11 }
  0x37   : > { %735 = dma.hbm_to_smem (!%p1035_p13), %s1216_s3, 16, %s935_s16, [#allocation7]  }
  0x38   : > { %s201_s19 = scalar_lea.vmem [#allocation8], %s1048_s11  ;;  %s1094_s28 = scalar_lea.hbm %s1215_s2, %s638_s18 }
  0x39   : > { %s208_s20 = sshll.u32 %s201_s19, 4  ;;  %s1100_s8 = scalar_lea.sflag [#allocation9], %s197_s9  ;;  %s1096_s20 = int_to_ptr.vmem [resolvable:$true] %s208_s20 }
  0x3a   : > { %s830_s6 = scalar_lea.hbm %s1094_s28, 2048  ;;  %p1228_p13 = scmp.ne.s32.totalorder %s1227_s10, 0 }
  0x3b   : > { %p831_p0 = scmp.ne.s32.totalorder %s1094_s28, %s830_s6  ;;  %s835_s12 = scalar_lea.hbm %s1215_s2, 49152 }
  0x3c   : > { %p832_p2 = pneg %p1228_p13  ;;  %p836_p6 = scmp.lt.u32.totalorder %s1094_s28, %s1215_s2 }
  0x3d   : > { %p837_p7 = scmp.lt.u32.totalorder %s835_s12, %s830_s6  ;;  %p839_p12 = scmp.lt.u32.totalorder %s830_s6, %s1094_s28 }
  0x3e   : > { %p833_p3 = pnand %p832_p2, %p831_p0 }
  0x3f   : > { %p838_p11 = por %p837_p7, %p836_p6 }
  0x40   : > { %p834_p4 = pneg %p833_p3 }
  0x41   : > { %p840_p1 = por %p839_p12, %p838_p11 }
  0x43   : > { %p841_p5 = pnand %p840_p1, %p834_p4 }
  0x45   : > { %844 = shalt.err (!%p841_p5)
}
  0x46   : > { %s845_s9 = scalar_lea.vmem %s1096_s20, 2048  ;;  %s936_s15 = smov [#allocation8]  }
  0x47   : > { %p846_p8 = scmp.ne.s32.totalorder %s1096_s20, %s845_s9  ;;  %s850_s16 = sshll.u32 %s936_s15, 4  ;;  %s851_s16 = int_to_ptr.vmem [resolvable:$false] %s850_s16 }
  0x48   : > { %s852_s7 = scalar_lea.vmem %s851_s16, 4096  ;;  %p853_p0 = scmp.lt.s32.totalorder %s1096_s20, %s851_s16 }
  0x49   : > { %p848_p9 = pnand %p846_p8, %p832_p2  ;;  %p854_p3 = scmp.lt.s32.totalorder %s852_s7, %s845_s9 }
  0x4b   : > { %p849_p10 = pneg %p848_p9  ;;  %p855_p6 = por %p854_p3, %p853_p0 }
  0x4d   : > { %p856_p7 = pnand %p855_p6, %p849_p10 }
  0x4f   : > { %859 = shalt.err (!%p856_p7)
}
  0x50   : > { %s937_s17 = smov 128   ;;  %s938_s18 = smov 8  }
  0x51   : > { %739 = dma.hbm_to_vmem [thread:$0]  (!%p1228_p13), %s1094_s28, 2048, %s1096_s20, %s1100_s8, %s937_s17, %s937_s17, %s938_s18  }
  0x52   : > { %p1229_p2 = scmp.ne.s32.totalorder %s1225_s30, 0 }
  0x53   : > { %p1230_p4 = scmp.eq.s32.totalorder (!%p1229_p2), %s997_s4, 0 }
  0x54   : > { %220 = sbr.rel (%p1229_p2) target bundleno = 563 (0x233), region = 40 }
  0x5b   : > { %903 = dma.done.wait (%p1230_p4), [#allocation5], 32   ;;  %p1231_p11 = pmov %p1230_p4 }
  0x5c   : > { %s226_s19 = sand.u32 1, %s924_s21   ;;  %p1232_p12 = scmp.ne.s32.totalorder %s1224_s29, 0 }
  0x5d   : > { %905 = vsyncadd (%p1231_p11), [#allocation5], 4294967264  ;;  %s630_s25 = sshll.u32 %s226_s19, 7  ;;  %s227_s26 = scalar_lea.sflag [#allocation9], %s226_s19 }
  0x5e   : > { %s1135_s6 = scalar_lea.vmem [#allocation8], %s630_s25 }
  0x5f   : > { %907 = dma.done.wait (%p1232_p12), %s227_s26, 2048  }
  0x60   : > { %909 = vsyncadd (%p1232_p12), %s227_s26, 4294965248  ;;  %p1233_p13 = pmov %p1230_p4 }
  0x61   : > { %p1234_p1 = pmov %p1230_p4 }
  0x62   : > { %911 = dma.done.wait (%p1233_p13), [#allocation7], 16  }
  0x63   : > { %913 = vsyncadd (%p1234_p1), [#allocation7], 4294967280 }
  0x64   : > { %239 = sfence }
  0x65   : > { %p1235_p5 = scmp.ne.s32.totalorder %s997_s4, 0 }
  0x66   : > { %v939_v0 = vmov (!%p1235_p5), 0.0  }
  0x67   : > { %260 = sbr.rel (%p1235_p5) target bundleno = 111 (0x6f), region = 56  ;;  %261 = vst [vmem:[#allocation2] sm:$0xff] (!%p1235_p5), %v939_v0  ;;  %262 = vst [vmem:[#allocation2 + $0x8] sm:$0xff] (!%p1235_p5), %v939_v0 }
  0x68   : > { %263 = vst [vmem:[#allocation2 + $0x10] sm:$0xff] (!%p1235_p5), %v939_v0  ;;  %264 = vst [vmem:[#allocation2 + $0x18] sm:$0xff] (!%p1235_p5), %v939_v0 }
  0x69   : > { %265 = vst [vmem:[#allocation2 + $0x20] sm:$0xff] (!%p1235_p5), %v939_v0  ;;  %266 = vst [vmem:[#allocation2 + $0x28] sm:$0xff] (!%p1235_p5), %v939_v0 }
  0x6a   : > { %267 = vst [vmem:[#allocation2 + $0x30] sm:$0xff] (!%p1235_p5), %v939_v0  ;;  %268 = vst [vmem:[#allocation2 + $0x38] sm:$0xff] (!%p1235_p5), %v939_v0 }
  0x6b   : > { %269 = vst [vmem:[#allocation2 + $0x40] sm:$0xff] (!%p1235_p5), %v939_v0  ;;  %270 = vst [vmem:[#allocation2 + $0x48] sm:$0xff] (!%p1235_p5), %v939_v0 }
  0x6c   : > { %271 = vst [vmem:[#allocation2 + $0x50] sm:$0xff] (!%p1235_p5), %v939_v0  ;;  %272 = vst [vmem:[#allocation2 + $0x58] sm:$0xff] (!%p1235_p5), %v939_v0 }
  0x6d   : > { %273 = vst [vmem:[#allocation2 + $0x60] sm:$0xff] (!%p1235_p5), %v939_v0  ;;  %274 = vst [vmem:[#allocation2 + $0x68] sm:$0xff] (!%p1235_p5), %v939_v0 }
  0x6e   : > { %275 = vst [vmem:[#allocation2 + $0x70] sm:$0xff] %v939_v0  ;;  %276 = vst [vmem:[#allocation2 + $0x78] sm:$0xff] %v939_v0 }
  0x6f PF: > { %s293_s29 = sld [smem:[#allocation10 + %s997_s4]]  ;;  %v294_v1 = vld [vmem:[%s1135_s6] sm:$0xff]  ;;  %v295_v2 = vld [vmem:[%s1135_s6 + $0x8] sm:$0xff]  ;;  %v296_v3 = vld [vmem:[%s1135_s6 + $0x10] sm:$0xff]  ;;  %p633_p8 = scmp.ne.s32.totalorder %s997_s4, 23 }
  0x70   : > { %v277_v4 = vld [vmem:[#allocation2] sm:$0xff]  ;;  %v278_v5 = vld [vmem:[#allocation2 + $0x8] sm:$0xff]  ;;  %v279_v6 = vld [vmem:[#allocation2 + $0x10] sm:$0xff]  ;;  %vm941_vm0 = vmmov (!%p633_p8), 0   ;;  %vm493_vm1 = vcmask (!%p633_p8), 1040384   ;;  %s502_s13 = sld [smem:[#allocation3]] (!%p633_p8) }
  0x71   : > { %v280_v7 = vld [vmem:[#allocation2 + $0x18] sm:$0xff]  ;;  %v298_v9 = vld [vmem:[%s1135_s6 + $0x20] sm:$0xff]  ;;  %v299_v10 = vld [vmem:[%s1135_s6 + $0x28] sm:$0xff]  ;;  %vm523_vm2 = vcmask (!%p633_p8), 130112   ;;  %vm534_vm3 = vcmask (!%p633_p8), 1041409   ;;  %vm537_vm4 = vcmask (!%p633_p8), 66560  }
  0x72   : > { %v297_v8 = vld [vmem:[%s1135_s6 + $0x18] sm:$0xff]  ;;  %v300_v11 = vld [vmem:[%s1135_s6 + $0x30] sm:$0xff]  ;;  %v282_v15 = vld [vmem:[#allocation2 + $0x28] sm:$0xff] }
  0x73   : > { %v301_v12 = vld [vmem:[%s1135_s6 + $0x38] sm:$0xff]  ;;  %v283_v16 = vld [vmem:[#allocation2 + $0x30] sm:$0xff]  ;;  %v302_v22 = vld [vmem:[%s1135_s6 + $0x40] sm:$0xff] }
  0x74   : > { %v281_v14 = vld [vmem:[#allocation2 + $0x20] sm:$0xff]  ;;  %v284_v21 = vld [vmem:[#allocation2 + $0x38] sm:$0xff]  ;;  %v303_v23 = vld [vmem:[%s1135_s6 + $0x48] sm:$0xff] }
  0x75   : > { %v310_v13 = vstv %s293_s29  ;;  %v285_v28 = vld [vmem:[#allocation2 + $0x40] sm:$0xff]  ;;  %v286_v29 = vld [vmem:[#allocation2 + $0x48] sm:$0xff]  ;;  %v287_v30 = vld [vmem:[#allocation2 + $0x50] sm:$0xff] }
  0x76   : > { %v311_v17 = vmul.f32 %v310_v13, %v294_v1  ;;  %v312_v18 = vmul.f32 %v310_v13, %v295_v2  ;;  %v313_v19 = vmul.f32 %v310_v13, %v296_v3  ;;  %v314_v20 = vmul.f32 %v310_v13, %v297_v8  ;;  %v304_v31 = vld [vmem:[%s1135_s6 + $0x50] sm:$0xff]  ;;  %v305_v32 = vld [vmem:[%s1135_s6 + $0x58] sm:$0xff]  ;;  %v306_v37 = vld [vmem:[%s1135_s6 + $0x60] sm:$0xff] }
  0x77   : > { %v315_v24 = vmul.f32 %v310_v13, %v298_v9  ;;  %v316_v25 = vmul.f32 %v310_v13, %v299_v10  ;;  %v317_v26 = vmul.f32 %v310_v13, %v300_v11  ;;  %v318_v27 = vmul.f32 %v310_v13, %v301_v12  ;;  %v307_v38 = vld [vmem:[%s1135_s6 + $0x68] sm:$0xff]  ;;  %v308_v39 = vld [vmem:[%s1135_s6 + $0x70] sm:$0xff]  ;;  %v289_v45 = vld [vmem:[#allocation2 + $0x60] sm:$0xff] }
  0x78   : > { %v327_v33 = vadd.f32 %v311_v17, %v277_v4  ;;  %v328_v34 = vadd.f32 %v312_v18, %v278_v5  ;;  %v329_v35 = vadd.f32 %v313_v19, %v279_v6  ;;  %v330_v36 = vadd.f32 %v314_v20, %v280_v7  ;;  %v288_v44 = vld [vmem:[#allocation2 + $0x58] sm:$0xff]  ;;  %v290_v51 = vld [vmem:[#allocation2 + $0x68] sm:$0xff]  ;;  %v291_v52 = vld [vmem:[#allocation2 + $0x70] sm:$0xff] }
  0x79   : > { %v331_v40 = vadd.f32 %v315_v24, %v281_v14  ;;  %v332_v41 = vadd.f32 %v316_v25, %v282_v15  ;;  %v333_v42 = vadd.f32 %v317_v26, %v283_v16  ;;  %v334_v43 = vadd.f32 %v318_v27, %v284_v21  ;;  %v309_v46 = vld [vmem:[%s1135_s6 + $0x78] sm:$0xff] }
  0x7a   : > { %343 = vst [vmem:[#allocation2] sm:$0xff] %v327_v33  ;;  %344 = vst [vmem:[#allocation2 + $0x8] sm:$0xff] %v328_v34  ;;  %v319_v47 = vmul.f32 %v310_v13, %v302_v22  ;;  %v320_v48 = vmul.f32 %v310_v13, %v303_v23  ;;  %v321_v49 = vmul.f32 %v310_v13, %v304_v31  ;;  %v292_v53 = vld [vmem:[#allocation2 + $0x78] sm:$0xff]  ;;  %v940_v5 = vmov (!%p633_p8), 0.0|0.0  }
  0x7b   : > { %345 = vst [vmem:[#allocation2 + $0x10] sm:$0xff] %v329_v35  ;;  %346 = vst [vmem:[#allocation2 + $0x18] sm:$0xff] %v330_v36  ;;  %v322_v50 = vmul.f32 %v310_v13, %v305_v32  ;;  %v323_v54 = vmul.f32 %v310_v13, %v306_v37  ;;  %v324_v55 = vmul.f32 %v310_v13, %v307_v38  ;;  %691 = vmatprep.subr.bf16.mxu0 (!%p633_p8), %v940_v5  ;;  %v942_v8 = vmov (!%p633_p8), 0.0  }
  0x7c   : > { %347 = vst [vmem:[#allocation2 + $0x20] sm:$0xff] %v331_v40  ;;  %348 = vst [vmem:[#allocation2 + $0x28] sm:$0xff] %v332_v41  ;;  %v325_v56 = vmul.f32 %v310_v13, %v308_v39  ;;  %v326_v57 = vmul.f32 %v310_v13, %v309_v46  ;;  %v335_v58 = vadd.f32 %v319_v47, %v285_v28  ;;  %362 = sbr.rel (%p633_p8) target bundleno = 538 (0x21a), region = 60  ;;  %688 = vmatprep.mubr.msk.f32.mxu0 (!%p633_p8), %vm941_vm0, %v942_v8  ;;  %v363_v28 = vld [vmem:[#allocation4] sm:$0x3] (!%p633_p8)  ;;  %v458_v31 = vlaneseq (!%p633_p8) }
  0x7d   : > { %349 = vst [vmem:[#allocation2 + $0x30] sm:$0xff] %v333_v42  ;;  %350 = vst [vmem:[#allocation2 + $0x38] sm:$0xff] %v334_v43  ;;  %v336_v59 = vadd.f32 %v320_v48, %v286_v29  ;;  %v337_v60 = vadd.f32 %v321_v49, %v287_v30  ;;  %v338_v61 = vadd.f32 %v322_v50, %v288_v44  ;;  %v943_v29 = vmov (!%p633_p8), 1966171168   ;;  %v450_v41 = vld [vmem:[%s1214_s1] sm:$0xff] (!%p633_p8) }
  0x7e   : > { %v339_v62 = vadd.f32 %v323_v54, %v289_v45  ;;  %v340_v63 = vadd.f32 %v324_v55, %v290_v51  ;;  %v341_v0 = vadd.f32 %v325_v56, %v291_v52  ;;  %v342_v1 = vadd.f32 %v326_v57, %v292_v53  ;;  %351 = vst [vmem:[#allocation2 + $0x40] sm:$0xff] %v335_v58  ;;  %v451_v44 = vld [vmem:[%s1214_s1 + $0x8] sm:$0x1] (!%p633_p8)  ;;  %v452_v45 = vld [vmem:[%s1214_s1 + $0x10] sm:$0xff] (!%p633_p8)  ;;  %v453_v48 = vld [vmem:[%s1214_s1 + $0x18] sm:$0x1] (!%p633_p8) }
  0x7f   : > { %352 = vst [vmem:[#allocation2 + $0x48] sm:$0xff] %v336_v59  ;;  %353 = vst [vmem:[#allocation2 + $0x50] sm:$0xff] %v337_v60  ;;  %v456_v30 = vunpack.c.l.s4 (!%p633_p8), %v943_v29  ;;  %v459_v33 = vshrl.u32 (!%p633_p8), %v458_v31, 7  ;;  %v513_v54 = vand.u32 (!%p633_p8), 127, %v458_v31  ;;  %v503_v57 = vstv (!%p633_p8), %s502_s13 }
  0x80   : > { %354 = vst [vmem:[#allocation2 + $0x58] sm:$0xff] %v338_v61  ;;  %355 = vst [vmem:[#allocation2 + $0x60] sm:$0xff] %v339_v62 }
  0x81   : > { %356 = vst [vmem:[#allocation2 + $0x68] sm:$0xff] %v340_v63  ;;  %357 = vst [vmem:[#allocation2 + $0x70] sm:$0xff] %v341_v0  ;;  %v364_v2 = vld [vmem:[#allocation2] sm:$0xff] (!%p633_p8)  ;;  %v365_v3 = vld [vmem:[#allocation2 + $0x8] sm:$0xff] (!%p633_p8)  ;;  %v457_v32 = vunpack.c.0.s8 (!%p633_p8), %v456_v30  ;;  %v479_v38 = vsub.s32 (!%p633_p8), 0, %v459_v33  ;;  %v518_v55 = vadd.s32 (!%p633_p8), 4294967288, %v513_v54  ;;  %v516_v61 = vsub.s32 (!%p633_p8), %v513_v54, %v459_v33 }
  0x82   : > { %358 = vst [vmem:[#allocation2 + $0x78] sm:$0xff] %v342_v1  ;;  %v366_v4 = vld [vmem:[#allocation2 + $0x10] sm:$0xff] (!%p633_p8)  ;;  %v692_v6 = vpack.c.bf16 (!%p633_p8), %v365_v3, %v364_v2  ;;  %v367_v7 = vld [vmem:[#allocation2 + $0x18] sm:$0xff] (!%p633_p8) }
  0x83   : > { %v695_v9 = vpack.c.bf16 %v367_v7, %v366_v4  ;;  %v368_v10 = vld [vmem:[#allocation2 + $0x20] sm:$0xff]  ;;  %v369_v11 = vld [vmem:[#allocation2 + $0x28] sm:$0xff]  ;;  %v460_v34 = vsub.s32 %v457_v32, %v459_v33  ;;  %v521_v59 = vsub.s32 %v518_v55, %v459_v33 }
  0x84   : > { %693 = vmatpush3.bf16.msra.mxu0 %v692_v6  ;;  %v698_v12 = vpack.c.bf16 %v369_v11, %v368_v10  ;;  %v370_v13 = vld [vmem:[#allocation2 + $0x30] sm:$0xff]  ;;  %v371_v14 = vld [vmem:[#allocation2 + $0x38] sm:$0xff] }
  0x85   : > { %694 = vmatprep.subr.bf16.mxu0 %v940_v5  ;;  %v701_v15 = vpack.c.bf16 %v371_v14, %v370_v13  ;;  %v372_v16 = vld [vmem:[#allocation2 + $0x40] sm:$0xff] }
  0x86   : > { %v373_v17 = vld [vmem:[#allocation2 + $0x48] sm:$0xff]  ;;  %v374_v19 = vld [vmem:[#allocation2 + $0x50] sm:$0xff] }
  0x87   : > { %v704_v18 = vpack.c.bf16 %v373_v17, %v372_v16  ;;  %v375_v20 = vld [vmem:[#allocation2 + $0x58] sm:$0xff]  ;;  %v376_v22 = vld [vmem:[#allocation2 + $0x60] sm:$0xff] }
  0x88   : > { %696 = vmatpush3.bf16.msra.mxu0 %v695_v9  ;;  %v707_v21 = vpack.c.bf16 %v375_v20, %v374_v19  ;;  %v377_v23 = vld [vmem:[#allocation2 + $0x68] sm:$0xff]  ;;  %v378_v25 = vld [vmem:[#allocation2 + $0x70] sm:$0xff] }
  0x89   : > { %697 = vmatprep.subr.bf16.mxu0 %v940_v5  ;;  %v710_v24 = vpack.c.bf16 %v377_v23, %v376_v22  ;;  %v379_v26 = vld [vmem:[#allocation2 + $0x78] sm:$0xff] }
  0x8a   : > { %v713_v27 = vpack.c.bf16 %v379_v26, %v378_v25 }
  0x8c   : > { %699 = vmatpush3.bf16.msra.mxu0 %v698_v12 }
  0x8d   : > { %700 = vmatprep.subr.bf16.mxu0 %v940_v5 }
  0x90   : > { %702 = vmatpush3.bf16.msra.mxu0 %v701_v15 }
  0x91   : > { %703 = vmatprep.subr.bf16.mxu0 %v940_v5 }
  0x94   : > { %705 = vmatpush3.bf16.msra.mxu0 %v704_v18 }
  0x95   : > { %706 = vmatprep.subr.bf16.mxu0 %v940_v5 }
  0x98   : > { %708 = vmatpush3.bf16.msra.mxu0 %v707_v21 }
  0x99   : > { %709 = vmatprep.subr.bf16.mxu0 %v940_v5 }
  0x9c   : > { %711 = vmatpush3.bf16.msra.mxu0 %v710_v24 }
  0x9d   : > { %712 = vmatprep.subr.bf16.mxu0 %v940_v5 }
  0xa0   : > { %714 = vmatpush3.bf16.msra.mxu0 %v713_v27 }
  0xa3   : > { %689 = vmatmul.mubr.f32.vlgmr.msra.gmra.mrb[0].mxu0 %v363_v28 }
 0x176   : > { %v446_v35 = vpop.f32.mrb[0].mxu0 }
 0x177   : > { %v461_v36 = vrot.slane %v446_v35, %v460_v34  ;;  %v690_v37 = vpop.f32.mrb[1].mxu0 }
 0x179   : > { %v462_v39 = vcombine.high %v461_v36, %v461_v36  ;;  %v469_v40 = vrot.slane %v461_v36, %v460_v34 }
 0x17b   : > { %v480_v42 = vrot.slane %v469_v40, %v479_v38  ;;  %v476_v43 = vrot.slane %v462_v39, %v460_v34 }
 0x17d   : > { %v487_v46 = vmul.f32 %v480_v42, %v450_v41  ;;  %v484_v47 = vrot.slane %v476_v43, %v479_v38  ;;  %v488_v49 = vmul.f32 %v480_v42, %v451_v44 }
 0x17f   : > { %491 = vadd.xlane.f32.xlu0 %v487_v46  ;;  %v489_v50 = vmul.f32 %v484_v47, %v452_v45  ;;  %v490_v51 = vmul.f32 %v484_v47, %v453_v48  ;;  %v494_v52 = vsel %vm493_vm1, %v488_v49, 0.0 }
 0x181   : > { %497 = vadd.xlane.f32.xlu1 %v489_v50  ;;  %v499_v53 = vsel %vm493_vm1, %v490_v51, 0.0 }
 0x183   : > { %495 = vadd.xlane.f32.xlu0 %v494_v52 }
 0x185   : > { %500 = vadd.xlane.f32.xlu1 %v499_v53 }
 0x20c   : > { %v492_v56 = vpop.xlane.xlu0 %491 }
 0x20d   : > { %v504_v62 = vadd.f32 %v503_v57, %v492_v56 }
 0x20e   : > { %v498_v58 = vpop.xlane.xlu1 %497 }
 0x20f   : > { %v506_v63 = vadd.f32 %v503_v57, %v498_v58  ;;  %v517_v4 = vrot.slane %v504_v62, %v516_v61 }
 0x210   : > { %v496_v60 = vpop.xlane.xlu0 %495 }
 0x211   : > { %v505_v0 = vadd.f32 %v503_v57, %v496_v60  ;;  %v528_v5 = vrot.slane %v506_v63, %v516_v61 }
 0x212   : > { %v501_v1 = vpop.xlane.xlu1 %500 }
 0x213   : > { %v522_v2 = vrot.slane %v505_v0, %v521_v59  ;;  %v507_v3 = vadd.f32 %v503_v57, %v501_v1 }
 0x215   : > { %v532_v6 = vrot.slane %v507_v3, %v521_v59  ;;  %v524_v7 = vsel %vm523_vm2, %v522_v2, %v517_v4 }
 0x217   : > { %v533_v8 = vsel %vm523_vm2, %v532_v6, %v528_v5 }
 0x218   : > { %v535_v9 = vsel %vm534_vm3, %v533_v8, %v524_v7 }
 0x219   : > { %538 = vst.msk [vmem:[#allocation11] sm:$0x3] %vm537_vm4, %v535_v9 }
 0x21a PF: > { %p745_p9 = scmp.eq.s32.totalorder %s997_s4, 23  ;;  %s944_s14 = smov [#allocation11]  }
 0x21b   : > { %s546_s9 = sshll.u32 %s944_s14, 4  ;;  %s547_s9 = int_to_ptr.vmem [resolvable:$true] %s546_s9 }
 0x21c   : > { %s860_s15 = scalar_lea.vmem %s547_s9, 32  ;;  %p867_p6 = scmp.lt.s32.totalorder %s547_s9, %s547_s9 }
 0x21d   : > { %p861_p10 = scmp.ne.s32.totalorder %s547_s9, %s860_s15  ;;  %p868_p7 = scmp.lt.s32.totalorder %s860_s15, %s860_s15 }
 0x21f   : > { %p862_p0 = pnand %p861_p10, %p745_p9  ;;  %p869_p2 = por %p868_p7, %p867_p6 }
 0x221   : > { %p863_p3 = pneg %p862_p0 }
 0x223   : > { %p870_p4 = pnand %p869_p2, %p863_p3 }
 0x225   : > { %873 = shalt.err (!%p870_p4)
}
 0x226   : > { %s874_s17 = scalar_lea.hbm %s1218_s5, 32 }
 0x227   : > { %p875_p11 = scmp.ne.s32.totalorder %s1218_s5, %s874_s17  ;;  %p880_p1 = scmp.lt.u32.totalorder %s874_s17, %s1218_s5 }
 0x229   : > { %p876_p12 = pnand %p875_p11, %p745_p9 }
 0x22b   : > { %p877_p13 = pneg %p876_p12 }
 0x22d   : > { %p882_p5 = pnand %p880_p1, %p877_p13 }
 0x22f   : > { %885 = shalt.err (!%p882_p5)
}
 0x230   : > { %726 = dma.vmem_to_hbm [thread:$0]  (%p745_p9), %s547_s9, 32, %s1218_s5, [#allocation6]  }
 0x231   : > { %915 = dma.done.wait (%p745_p9), [#allocation6], 32  }
 0x232   : > { %917 = vsyncadd (%p745_p9), [#allocation6], 4294967264 }
 0x233 PF: > { %p19_p8 = scmp.ge.s32.totalorder %s1000_s24, 26   ;;  %s1236_s20 = smov %s924_s21 }
 0x234   : > { %s1237_s21 = smov %s928_s22  ;;  %s1238_s22 = smov %s1010_s27 }
 0x235   : > { %s1239_s23 = smov %s1000_s24  ;;  %21 = sbr.rel (!%p19_p8) target bundleno = 8 (0x8), region = 95 }
 0x23c   :  { %559 = vsyncpa [#allocation5], 1 }
 0x23d   :  { %561 = vsyncpa [#allocation5 + $0x1], 1 }
 0x23e   :  { %562 = vsyncpa [#allocation9], 1 }
 0x23f   :  { %564 = vsyncpa [#allocation9 + $0x1], 1 }
 0x240   :  { %565 = vsyncpa [#allocation6], 1 }
 0x241   :  { %567 = vsyncpa [#allocation6 + $0x1], 1 }
 0x242   :  { %568 = vsyncpa [#allocation7], 1 }
 0x243   :  { %570 = vsyncpa [#allocation7 + $0x1], 1 }

</bundles_post_ra>
